<compile_context>
chip_gen: v5e
topology: v5e:2x2
jax: 0.10.0
libtpu: 0.0.40
codegen_flags: <defaults>
</compile_context>

<pallas_src>
import math
from functools import partial

import jax
import jax.numpy as jnp
from jax import lax
from jax.experimental import pallas as pl
from jax.experimental.pallas import tpu as pltpu


# ------------------------------- Pallas kernel ------------------------------ #

def _patch_embed_kernel(eps, inv_n, x_ref, w_ref, p_ref, o_ref):
    """Fused Conv3d((3,p,p), stride (2,p,p)) + bias + LayerNorm for one (TS, N) output tile.

    x_ref : (TS, Kpad) bf16  -- im2col rows (3 temporal taps concatenated, zero-padded to Kpad)
    w_ref : (Kpad, N)  bf16  -- flattened conv weight (zero rows for the K padding)
    p_ref : (3, N)     f32   -- row 0: conv bias, row 1: LN gamma, row 2: LN beta
    o_ref : (TS, N)    f32
    """
    # Single MXU matmul over the folded K = 3 * p * p * C (padded to a lane-dense multiple of 128).
    acc = jnp.dot(x_ref[...], w_ref[...], preferred_element_type=jnp.float32)
    acc = acc + p_ref[0:1, :]

    # Fused LayerNorm over the channel (lane) axis, parallel-reduction form:
    # both reductions feed the XLU concurrently; var = E[x^2] - mu^2 in f32 (eps=1e-5 is safe here).
    s1 = jnp.sum(acc, axis=-1, keepdims=True)
    s2 = jnp.sum(acc * acc, axis=-1, keepdims=True)
    mu = s1 * inv_n
    var = s2 * inv_n - mu * mu
    inv = lax.rsqrt(var + eps)
    o_ref[...] = ((acc - mu) * inv) * p_ref[1:2, :] + p_ref[2:3, :]


# --------------------------------- helpers ---------------------------------- #

def _round_up(v, m):
    return ((v + m - 1) // m) * m


def _vmem_capacity_bytes():
    """Per-core VMEM capacity; conservative 64 MiB fallback (v7x per-TC)."""
    try:
        info = pltpu.get_tpu_info()
        cap = getattr(info, "vmem_capacity_bytes", None)
        if cap:
            return int(cap)
    except Exception:
        pass
    return 64 << 20


def _tile_vmem_bytes(ts, k_pad, n):
    """Double-buffered input/output tiles + double-buffered weight + merged scalar params."""
    return (2 * (ts * k_pad * 2 + ts * n * 4)   # bf16 im2col tile + f32 output tile, x2 buffers
            + 2 * (k_pad * n * 2)               # bf16 weight, x2 buffers (constant index, still counted)
            + 2 * (3 * n * 4))                  # merged (3, N) f32 params


def _pick_row_tile(s_rows, k_pad, n, vmem_budget, max_rows):
    """Largest multiple-of-8 divisor of s_rows that fits the VMEM budget (capped at max_rows)."""
    start = min(s_rows, max_rows)
    start -= start % 8
    ts = min(8, s_rows)
    for cand in range(start, 7, -8):
        if s_rows % cand == 0 and _tile_vmem_bytes(cand, k_pad, n) <= vmem_budget:
            ts = cand
            break
    return ts


# --------------------------------- wrapper ----------------------------------- #

def special_patch_embed(x_ncdhw, w_conv, b_conv, ln_g, ln_b, *, patch_size, eps=1e-5, max_rows=2048):
    """SpeicalPatchEmbed forward.

    x_ncdhw : (B, C, T, H, W) f32
    w_conv  : (embed_dim, C, 3, p, p) f32   (PyTorch Conv3d layout)
    b_conv  : (embed_dim,) f32
    ln_g/ln_b : (embed_dim,) f32
    returns : (B, embed_dim, T_out, H//p, W//p) f32   (same NCDHW layout as the PyTorch module)
    """
    B, C, T, H, W = x_ncdhw.shape
    p = patch_size
    assert H % p == 0 and W % p == 0, "H, W must be divisible by patch_size"
    N = w_conv.shape[0]
    T_out = (T - 1) // 2 + 1          # (T + 2*1 - 3)//2 + 1
    Ho, Wo = H // p, W // p
    S = Ho * Wo
    Kf = p * p * C
    K = 3 * Kf                         # folded temporal taps
    Kpad = _round_up(K, 128)           # lane-dense K for the MXU
    Spad = _round_up(S, 8)             # keep (8,128)-aligned row tiles
    Tp = T + 2

    # --- layout-only prep in the wrapper (XLA ops) ---
    # NCDHW -> channels-last, zero-pad T by 1 each side (Conv3d padding=(1,0,0)).
    xt = jnp.transpose(x_ncdhw, (0, 2, 3, 4, 1))                    # (B, T, H, W, C)
    xt = jnp.pad(xt, ((0, 0), (1, 1), (0, 0), (0, 0), (0, 0)))      # (B, T+2, H, W, C)
    # Non-overlapping spatial p x p patches -> per-frame rows (kh, kw, c flattening).
    frames = xt.reshape(B, Tp, Ho, p, Wo, p, C)
    frames = frames.transpose(0, 1, 2, 4, 3, 5, 6).reshape(B, Tp, S, Kf)
    # Fold the 3 temporal taps of the stride-2 window into the feature axis: (B, T_out, S, 3*Kf).
    t_idx = 2 * jnp.arange(T_out)[:, None] + jnp.arange(3)[None, :]  # (T_out, 3) padded frame indices
    x_cat = frames[:, t_idx]                                         # (B, T_out, 3, S, Kf)
    x_cat = jnp.transpose(x_cat, (0, 1, 3, 2, 4)).reshape(B, T_out, S, K)
    x_cat = jnp.pad(x_cat, ((0, 0), (0, 0), (0, Spad - S), (0, Kpad - K)))
    x_cat = x_cat.astype(jnp.bfloat16)

    # Weight -> (3*Kf, N) matching the (dt, kh, kw, c) flattening of the im2col rows; zero-pad K.
    w_k = jnp.transpose(w_conv, (2, 3, 4, 1, 0)).reshape(K, N)
    w_k = jnp.pad(w_k, ((0, Kpad - K), (0, 0))).astype(jnp.bfloat16)

    # Merge conv bias + LN gamma + LN beta into a single (3, N) f32 operand.
    params = jnp.stack([b_conv, ln_g, ln_b], axis=0).astype(jnp.float32)

    # --- tiling derived from the real VMEM budget ---
    vmem_cap = _vmem_capacity_bytes()
    budget = int(vmem_cap * 0.35)                       # headroom for compiler scratch / pipelining
    TS = _pick_row_tile(Spad, Kpad, N, budget, max_rows)
    # Megacore: keep >= 2 parallel grid steps so the second TensorCore (v7x) isn't idle.
    while B * T_out * (Spad // TS) < 2 and TS >= 16 and (TS // 2) % 8 == 0 and Spad % (TS // 2) == 0:
        TS //= 2
    grid = (B, T_out, Spad // TS)
    vmem_limit = max(32 << 20, min(int(vmem_cap * 0.9), 96 << 20))

    flops = 2 * B * T_out * Spad * Kpad * N
    bytes_accessed = (B * T_out * Spad * Kpad * 2       # bf16 im2col reads
                      + Kpad * N * 2                     # bf16 weight
                      + 3 * N * 4                        # params
                      + B * T_out * Spad * N * 4)        # f32 output
    out = pl.pallas_call(
        partial(_patch_embed_kernel, eps, 1.0 / N),
        out_shape=jax.ShapeDtypeStruct((B, T_out, Spad, N), jnp.float32),
        grid=grid,
        in_specs=[
            pl.BlockSpec((None, None, TS, Kpad), lambda b, t, s: (b, t, s, 0)),
            pl.BlockSpec((Kpad, N), lambda b, t, s: (0, 0)),
            pl.BlockSpec((3, N), lambda b, t, s: (0, 0)),
        ],
        out_specs=pl.BlockSpec((None, None, TS, N), lambda b, t, s: (b, t, s, 0)),
        compiler_params=pltpu.CompilerParams(
            dimension_semantics=("parallel", "parallel", "parallel"),
            vmem_limit_bytes=vmem_limit),
        cost_estimate=pl.CostEstimate(flops=flops,
                                      transcendentals=B * T_out * Spad,
                                      bytes_accessed=bytes_accessed),
    )(x_cat, w_k, params)

    # Drop spatial pad rows, then reshape + permute back to NCDHW like the PyTorch module.
    out = out[:, :, :S, :].reshape(B, T_out, Ho, Wo, N)
    return jnp.transpose(out, (0, 4, 1, 2, 3))


# ---------------------------- pure-JAX reference ---------------------------- #

def reference(x_ncdhw, w_conv, b_conv, ln_g, ln_b, patch_size, eps=1e-5):
    """f32 reference: Conv3d((3,p,p), stride (2,p,p), pad (1,0,0)) + LayerNorm, NCDHW in/out."""
    p = patch_size
    y = lax.conv_general_dilated(
        x_ncdhw, w_conv,
        window_strides=(2, p, p),
        padding=((1, 1), (0, 0), (0, 0)),
        dimension_numbers=('NCDHW', 'OIDHW', 'NCDHW'))
    y = y + b_conv.reshape(1, -1, 1, 1, 1)
    B, C, T, H, W = y.shape
    z = y.reshape(B, C, -1).transpose(0, 2, 1)      # flatten(2).transpose(1,2)
    mu = z.mean(-1, keepdims=True)
    var = ((z - mu) ** 2).mean(-1, keepdims=True)
    z = (z - mu) / jnp.sqrt(var + eps) * ln_g + ln_b
    return z.reshape(B, T, H, W, C).transpose(0, 4, 1, 2, 3)


# ----------------------------------- main ----------------------------------- #

if __name__ == "__main__":
    B, C, T, H, W = 2, 2, 4, 32, 32
    patch_size = 4
    embed_dim = 128   # lane-dense (multiple of 128)

    key = jax.random.PRNGKey(0)
    k1, k2, k3, k4, k5 = jax.random.split(key, 5)
    x = jax.random.normal(k1, (B, C, T, H, W), jnp.float32)
    w_conv = 0.02 * jax.random.normal(k2, (embed_dim, C, 3, patch_size, patch_size), jnp.float32)
    b_conv = 0.02 * jax.random.normal(k3, (embed_dim,), jnp.float32)
    ln_g = 1.0 + 0.1 * jax.random.normal(k4, (embed_dim,), jnp.float32)
    ln_b = 0.1 * jax.random.normal(k5, (embed_dim,), jnp.float32)

    fwd = jax.jit(partial(special_patch_embed, patch_size=patch_size))
    out = fwd(x, w_conv, b_conv, ln_g, ln_b)
    out = jax.block_until_ready(out)

    T_out = (T - 1) // 2 + 1
    assert out.shape == (B, embed_dim, T_out, H // patch_size, W // patch_size), out.shape
    assert bool(jnp.all(jnp.isfinite(out)))

    # Numerical check vs f32 reference (bf16 matmul inputs -> loose tolerance).
    ref = reference(x, w_conv, b_conv, ln_g, ln_b, patch_size)
    err = float(jnp.max(jnp.abs(out - ref)))
    assert err < 1e-1, f"max abs err vs reference: {err}"

    print("KERNEL_OK")
</pallas_src>

<mosaic_0001>
module attributes {stable_mosaic.version = 11 : i64} {
  func.func @_patch_embed_kernel(%arg0: i32, %arg1: i32, %arg2: i32, %arg3: memref<1x1x64x128xbf16, #tpu.memory_space<vmem>>, %arg4: memref<128x128xbf16, #tpu.memory_space<vmem>>, %arg5: memref<3x128xf32, #tpu.memory_space<vmem>>, %arg6: memref<1x1x64x128xf32, #tpu.memory_space<vmem>>) attributes {dimension_semantics = [#tpu.dimension_semantics<parallel>, #tpu.dimension_semantics<parallel>, #tpu.dimension_semantics<parallel>], iteration_bounds = array<i64: 2, 2, 1>, scalar_prefetch = 0 : i64, scratch_operands = 0 : i64, tpu.core_type = #tpu.core_type<tc>, window_params = [{transform_indices = @transform_0, window_bounds = array<i64: 1, 1, 64, 128>}, {pipeline_mode = #tpu.pipeline_mode<synchronous>, transform_indices = @transform_1, window_bounds = array<i64: 128, 128>}, {pipeline_mode = #tpu.pipeline_mode<synchronous>, transform_indices = @transform_2, window_bounds = array<i64: 3, 128>}, {transform_indices = @transform_3, window_bounds = array<i64: 1, 1, 64, 128>}]} {
    %c0 = arith.constant 0 : index
    %c0_0 = arith.constant 0 : index
    %c0_1 = arith.constant 0 : index
    %c0_2 = arith.constant 0 : index
    %0 = vector.load %arg3[%c0, %c0_0, %c0_1, %c0_2] : memref<1x1x64x128xbf16, #tpu.memory_space<vmem>>, vector<1x1x64x128xbf16>
    %1 = vector.shape_cast %0 : vector<1x1x64x128xbf16> to vector<64x128xbf16>
    %c0_3 = arith.constant 0 : index
    %c0_4 = arith.constant 0 : index
    %2 = vector.load %arg4[%c0_3, %c0_4] : memref<128x128xbf16, #tpu.memory_space<vmem>>, vector<128x128xbf16>
    %cst = arith.constant dense<0.000000e+00> : vector<64x128xf32>
    %3 = tpu.matmul %1, %2, %cst {dimension_numbers = #tpu.dot_dimension_numbers<[1], [0], [0], [1], [0, 0, 1, 1], [], []>} : vector<64x128xbf16>, vector<128x128xbf16>, vector<64x128xf32> -> vector<64x128xf32>
    %c0_5 = arith.constant 0 : index
    %c0_6 = arith.constant 0 : index
    %4 = vector.load %arg5[%c0_5, %c0_6] : memref<3x128xf32, #tpu.memory_space<vmem>>, vector<1x128xf32>
    %5 = vector.broadcast %4 : vector<1x128xf32> to vector<64x128xf32>
    %6 = arith.addf %3, %5 : vector<64x128xf32>
    %cst_7 = arith.constant dense<0.000000e+00> : vector<64xf32>
    %7 = vector.multi_reduction <add>, %6, %cst_7 [1] : vector<64x128xf32> to vector<64xf32>
    %8 = vector.shape_cast %7 : vector<64xf32> to vector<64x1xf32>
    %9 = arith.mulf %6, %6 : vector<64x128xf32>
    %cst_8 = arith.constant dense<0.000000e+00> : vector<64xf32>
    %10 = vector.multi_reduction <add>, %9, %cst_8 [1] : vector<64x128xf32> to vector<64xf32>
    %11 = vector.shape_cast %10 : vector<64xf32> to vector<64x1xf32>
    %cst_9 = arith.constant 7.812500e-03 : f32
    %12 = vector.broadcast %cst_9 : f32 to vector<64x1xf32>
    %13 = arith.mulf %8, %12 : vector<64x1xf32>
    %cst_10 = arith.constant 7.812500e-03 : f32
    %14 = vector.broadcast %cst_10 : f32 to vector<64x1xf32>
    %15 = arith.mulf %11, %14 : vector<64x1xf32>
    %16 = arith.mulf %13, %13 : vector<64x1xf32>
    %17 = arith.subf %15, %16 : vector<64x1xf32>
    %cst_11 = arith.constant 9.99999974E-6 : f32
    %18 = vector.broadcast %cst_11 : f32 to vector<64x1xf32>
    %19 = arith.addf %17, %18 : vector<64x1xf32>
    %20 = math.rsqrt %19 : vector<64x1xf32>
    %21 = vector.broadcast %13 : vector<64x1xf32> to vector<64x128xf32>
    %22 = arith.subf %6, %21 : vector<64x128xf32>
    %23 = vector.broadcast %20 : vector<64x1xf32> to vector<64x128xf32>
    %24 = arith.mulf %22, %23 : vector<64x128xf32>
    %c1 = arith.constant 1 : index
    %c0_12 = arith.constant 0 : index
    %25 = vector.load %arg5[%c1, %c0_12] : memref<3x128xf32, #tpu.memory_space<vmem>>, vector<1x128xf32>
    %26 = vector.broadcast %25 : vector<1x128xf32> to vector<64x128xf32>
    %27 = arith.mulf %24, %26 : vector<64x128xf32>
    %c2 = arith.constant 2 : index
    %c0_13 = arith.constant 0 : index
    %28 = vector.load %arg5[%c2, %c0_13] : memref<3x128xf32, #tpu.memory_space<vmem>>, vector<1x128xf32>
    %29 = vector.broadcast %28 : vector<1x128xf32> to vector<64x128xf32>
    %30 = arith.addf %27, %29 : vector<64x128xf32>
    %c0_14 = arith.constant 0 : index
    %c0_15 = arith.constant 0 : index
    %c0_16 = arith.constant 0 : index
    %c0_17 = arith.constant 0 : index
    %31 = vector.load %arg6[%c0_14, %c0_15, %c0_16, %c0_17] : memref<1x1x64x128xf32, #tpu.memory_space<vmem>>, vector<1x1x64x128xf32>
    %32 = vector.shape_cast %31 : vector<1x1x64x128xf32> to vector<64x128xf32>
    %33 = vector.shape_cast %30 : vector<64x128xf32> to vector<1x1x64x128xf32>
    tpu.vector_store %arg6[%c0_14, %c0_15, %c0_16, %c0_17], %33 {strides = array<i32>} : memref<1x1x64x128xf32, #tpu.memory_space<vmem>>, vector<1x1x64x128xf32>,
    return
  }
  func.func @transform_0(%arg0: i32, %arg1: i32, %arg2: i32) -> (i32, i32, i32, i32) {
    %c0_i32 = arith.constant 0 : i32
    %c0_i32_0 = arith.constant 0 : i32
    return %arg0, %arg1, %arg2, %c0_i32 : i32, i32, i32, i32
  }
  func.func @transform_1(%arg0: i32, %arg1: i32, %arg2: i32) -> (i32, i32) {
    %c0_i32 = arith.constant 0 : i32
    %c0_i32_0 = arith.constant 0 : i32
    %c0_i32_1 = arith.constant 0 : i32
    return %c0_i32, %c0_i32_0 : i32, i32
  }
  func.func @transform_2(%arg0: i32, %arg1: i32, %arg2: i32) -> (i32, i32) {
    %c0_i32 = arith.constant 0 : i32
    %c0_i32_0 = arith.constant 0 : i32
    %c0_i32_1 = arith.constant 0 : i32
    return %c0_i32, %c0_i32_0 : i32, i32
  }
  func.func @transform_3(%arg0: i32, %arg1: i32, %arg2: i32) -> (i32, i32, i32, i32) {
    %c0_i32 = arith.constant 0 : i32
    %c0_i32_0 = arith.constant 0 : i32
    return %arg0, %arg1, %arg2, %c0_i32 : i32, i32, i32, i32
  }
}

</mosaic_0001>

<bundles_post_ra>
// kernel: special_patch_embed.1
= control target key start
LH: loop header
LB: loop body
LE: loop exit
PB: predicated region body
PF: predicated region fallthrough
CT: control target
= control target key end

     0   :  { %8 = vsyncpa [#allocation3], 0  ;;  %s1281_s0 = inlined_call_operand.vmem [shape: bf16[2,2,64,128], index: 0, kind: input, shape index: {}]   ;;  %s1282_s1 = inlined_call_operand.vmem [shape: bf16[128,128], index: 1, kind: input, shape index: {}]   ;;  %s1283_s2 = inlined_call_operand.vmem [shape: f32[3,128], index: 2, kind: input, shape index: {}]   ;;  %s1284_s3 = inlined_call_operand.hbm [shape: f32[2,2,64,128], index: 3, kind: output, shape index: {}]  }
   0x1   :  { %10 = vsyncpa [#allocation3 + $0x1], 0  ;;  %s976_s12 = smov 0   ;;  %s978_s13 = smov 0  }
   0x2   :  { %s980_s14 = smov 0   ;;  %s982_s15 = smov 0  }
   0x3   :  { %s984_s16 = smov 0   ;;  %s986_s17 = smov 0  }
   0x4   :  { %s988_s18 = smov 0   ;;  %s990_s19 = smov 0  }
   0x5 LB: > { %s667_s20 = sadd.s32 4294967295, %s952_s19   ;;  %s668_s21 = sadd.s32 4294967294, %s952_s19   ;;  %s952_s19 = sphi %s990_s19, %s16_s19   ;;  %s948_s18 = sphi %s988_s18, %s1293_s18   ;;  %s944_s17 = sphi %s986_s17, %s1292_s17   ;;  %s940_s16 = sphi %s984_s16, %s1291_s16   ;;  %s936_s15 = sphi %s982_s15, %s1290_s15   ;;  %s932_s14 = sphi %s980_s14, %s1289_s14   ;;  %s928_s13 = sphi %s978_s13, %s1288_s13   ;;  %s924_s12 = sphi %s976_s12, %s1287_s12  }
   0x6   : > { %s31_s22 = sadd.s32 1, %s944_s17  ;;  %s35_s23 = sadd.s32 1, %s948_s18 }
   0x7   : > { %p33_p0 = scmp.ge.s32.totalorder %s31_s22, 2  ;;  %p128_p1 = scmp.ne.s32.totalorder %s932_s14, %s928_s13 }
   0x8   : > { %p129_p2 = scmp.eq.s32.totalorder %s667_s20, 3  ;;  %p134_p5 = scmp.ne.s32.totalorder %s928_s13, %s924_s12 }
   0x9   : > { %s1295_s22 = smov (%p33_p0, %s31_s22), 0  ;;  %s1297_s23 = smov (!%p33_p0, %s35_s23), %s948_s18 }
   0xa   : > { %s112_s24 = ssub.s32 %s944_s17, %s1295_s22  ;;  %p1027_p3 = por %p129_p2, %p128_p1 }
   0xb   : > { %p37_p4 = scmp.ge.s32.totalorder %s1297_s23, 2  ;;  %p135_p6 = scmp.eq.s32.totalorder %s668_s21, 3 }
   0xc   : > { %p671_p7 = scmp.ge.s32.totalorder %s952_s19, 1  ;;  %p176_p9 = scmp.lt.s32.totalorder %s952_s19, 5 }
   0xd   : > { %s1299_s23 = smov (%p37_p4, %s1297_s23), 0  ;;  %p1036_p8 = por %p135_p6, %p134_p5 }
   0xe   : > { %s111_s27 = ssub.s32 %s948_s18, %s1299_s23  ;;  %s118_s28 = sadd.s32 1, %s932_s14 }
   0xf   : > { %s113_s29 = sor.u32 %s112_s24, %s111_s27  ;;  %p177_p10 = pnand %p671_p7, %p176_p9 }
  0x10   : > { %p116_p11 = scmp.eq.s32.totalorder %s113_s29, 0  ;;  %p209_p12 = scmp.lt.s32.totalorder (!%p177_p10), %s940_s16, 1 }
  0x11   : > { %180 = sbr.rel (%p177_p10) target bundleno = 372 (0x174), region = 32  ;;  %p211_p13 = scmp.lt.s32.totalorder (!%p177_p10), %s936_s15, 1 }
  0x12   : > { %s1045_s30 = scalar_select %p116_p11, %s932_s14, %s118_s28  }
  0x13   : > { %s725_s10 = sshll.u32 (!%p177_p10), %s936_s15, 3  ;;  %s726_s11 = sshll.u32 (!%p177_p10), %s940_s16, 4 }
  0x16   : > { %v741_v0 = vld [vmem:[%s1282_s1 + $0x38] sm:$0xff]  ;;  %v740_v1 = vld [vmem:[%s1282_s1 + $0x30] sm:$0xff]  ;;  %v739_v2 = vld [vmem:[%s1282_s1 + $0x28] sm:$0xff]  ;;  %s210_s20 = scalar_select %p209_p12, %s940_s16, 1 }
  0x17   : > { %321 = vmatpush.bf16.msra.mxu0 %v741_v0  ;;  %742 = vmatpush.bf16.msra.mxu1 %v741_v0  ;;  %v738_v3 = vld [vmem:[%s1282_s1 + $0x20] sm:$0xff]  ;;  %s212_s21 = scalar_select %p211_p13, %s936_s15, 1  ;;  %v737_v4 = vld [vmem:[%s1282_s1 + $0x18] sm:$0xff]  ;;  %v736_v5 = vld [vmem:[%s1282_s1 + $0x10] sm:$0xff] }
  0x18   : > { %744 = vmatpush.bf16.msra.mxu3 %v741_v0  ;;  %743 = vmatpush.bf16.msra.mxu2 %v741_v0  ;;  %s674_s29 = sshll.u32 %s210_s20, 4  ;;  %v735_v6 = vld [vmem:[%s1282_s1 + $0x8] sm:$0xff]  ;;  %v734_v7 = vld [vmem:[%s1282_s1] sm:$0xff]  ;;  %s568_s15 = sadd.s32 %s726_s11, %s725_s10 }
  0x19   : > { %s673_s28 = sshll.u32 %s212_s21, 3  ;;  %v839_v12 = vld [vmem:[%s1283_s2] ss:$0 sm:$0xff]  ;;  %s727_s16 = sshll.u32 %s568_s15, 3 }
  0x1a   : > { %s218_s6 = sadd.s32 %s674_s29, %s673_s28  ;;  %s205_s29 = sand.u32 1, %s928_s13  }
  0x1b   : > { %322 = vmatpush.bf16.msra.mxu0 %v740_v1  ;;  %745 = vmatpush.bf16.msra.mxu1 %v740_v1  ;;  %s675_s9 = sshll.u32 %s218_s6, 2  ;;  %s672_s8 = sshll.u32 %s205_s29, 6 }
  0x1c   : > { %747 = vmatpush.bf16.msra.mxu3 %v740_v1  ;;  %746 = vmatpush.bf16.msra.mxu2 %v740_v1  ;;  %s220_s24 = scalar_lea.vmem %s1281_s0, %s675_s9  ;;  %s1166_s9 = scalar_lea.vmem [#allocation2], %s672_s8 }
  0x1d   : > { %v730_v8 = vld [vmem:[%s220_s24] sm:$0xff]  ;;  %v731_v9 = vld [vmem:[%s220_s24 + $0x8] sm:$0xff]  ;;  %v733_v10 = vld [vmem:[%s220_s24 + $0x18] sm:$0xff]  ;;  %s571_s27 = sshll.u32 %s1166_s9, 4  ;;  %s555_s4 = scalar_lea.sflag [#allocation3], %s205_s29  ;;  %s572_s27 = int_to_ptr.vmem [resolvable:$true] %s571_s27 }
  0x1e   : > { %v732_v11 = vld [vmem:[%s220_s24 + $0x10] sm:$0xff]  ;;  %s570_s24 = scalar_lea.hbm %s1284_s3, %s727_s16  ;;  %s878_s10 = scalar_lea.hbm %s1284_s3, 256 }
  0x1f   : > { %323 = vmatpush.bf16.msra.mxu0 %v739_v2  ;;  %748 = vmatpush.bf16.msra.mxu1 %v739_v2  ;;  %s573_s28 = sshll.u32 %s570_s24, 4  ;;  %s574_s28 = int_to_ptr.hbm [resolvable:$true] %s573_s28 }
  0x20   : > { %750 = vmatpush.bf16.msra.mxu3 %v739_v2  ;;  %749 = vmatpush.bf16.msra.mxu2 %v739_v2  ;;  %s872_s5 = sshra.s32 %s574_s28, 4  ;;  %s873_s5 = int_to_ptr.hbm [resolvable:$true] %s872_s5 }
  0x21   : > { %s874_s6 = scalar_lea.hbm %s873_s5, 64  ;;  %p879_p4 = scmp.lt.s32.totalorder %s873_s5, %s1284_s3 }
  0x22   : > { %p875_p0 = scmp.ne.s32.totalorder %s873_s5, %s874_s6  ;;  %p880_p5 = scmp.lt.s32.totalorder %s878_s10, %s874_s6 }
  0x23   : > { %324 = vmatpush.bf16.msra.mxu0 %v738_v3  ;;  %751 = vmatpush.bf16.msra.mxu1 %v738_v3 }
  0x24   : > { %753 = vmatpush.bf16.msra.mxu3 %v738_v3  ;;  %752 = vmatpush.bf16.msra.mxu2 %v738_v3  ;;  %p876_p1 = pnand %p875_p0, %p1027_p3  ;;  %p881_p6 = por %p880_p5, %p879_p4 }
  0x26   : > { %p877_p2 = pneg %p876_p1 }
  0x27   : > { %325 = vmatpush.bf16.msra.mxu0 %v737_v4  ;;  %754 = vmatpush.bf16.msra.mxu1 %v737_v4 }
  0x28   : > { %756 = vmatpush.bf16.msra.mxu3 %v737_v4  ;;  %755 = vmatpush.bf16.msra.mxu2 %v737_v4  ;;  %p882_p7 = pnand %p881_p6, %p877_p2 }
  0x2b   : > { %326 = vmatpush.bf16.msra.mxu0 %v736_v5  ;;  %757 = vmatpush.bf16.msra.mxu1 %v736_v5 }
  0x2c   : > { %759 = vmatpush.bf16.msra.mxu3 %v736_v5  ;;  %758 = vmatpush.bf16.msra.mxu2 %v736_v5 }
  0x2f   : > { %327 = vmatpush.bf16.msra.mxu0 %v735_v6  ;;  %760 = vmatpush.bf16.msra.mxu1 %v735_v6 }
  0x30   : > { %762 = vmatpush.bf16.msra.mxu3 %v735_v6  ;;  %761 = vmatpush.bf16.msra.mxu2 %v735_v6 }
  0x33   : > { %328 = vmatpush.bf16.msra.mxu0 %v734_v7  ;;  %763 = vmatpush.bf16.msra.mxu1 %v734_v7 }
  0x34   : > { %765 = vmatpush.bf16.msra.mxu3 %v734_v7  ;;  %764 = vmatpush.bf16.msra.mxu2 %v734_v7 }
  0x36   : > { %329 = vmatmul.bf16.vlgmr.msra.gmra.mxu0 %v730_v8  ;;  %334 = vmatmul.bf16.vlgmr.msra.gmra.mxu1 %v731_v9 }
  0x37   : > { %344 = vmatmul.bf16.vlgmr.msra.gmra.mxu3 %v733_v10  ;;  %339 = vmatmul.bf16.vlgmr.msra.gmra.mxu2 %v732_v11 }
  0xb3   : > { %v330_v13 = vpop.f32.mrf.mxu0  ;;  %v335_v14 = vpop.f32.mrf.mxu1 }
  0xb4   : > { %v1081_v15 = vadd.f32 %v839_v12, %v330_v13  ;;  %v1083_v16 = vadd.f32 %v839_v12, %v335_v14 }
  0xb6   : > { %354 = vadd.xlane.f32.xlu1 %v1083_v16  ;;  %350 = vadd.xlane.f32.xlu0 %v1081_v15  ;;  %v366_v17 = vmul.f32 %v1081_v15, %v1081_v15  ;;  %v368_v19 = vmul.f32 %v1083_v16, %v1083_v16 }
  0xb8   : > { %374 = vadd.xlane.f32.xlu2 %v366_v17 }
  0xba   : > { %v345_v18 = vpop.f32.mrf.mxu3  ;;  %v340_v21 = vpop.f32.mrf.mxu2 }
  0xbb   : > { %v1091_v20 = vadd.f32 %v839_v12, %v345_v18  ;;  %v1093_v22 = vadd.f32 %v839_v12, %v340_v21  ;;  %v337_v23 = vpop.f32.mrf.mxu1  ;;  %v332_v24 = vpop.f32.mrf.mxu0 }
  0xbc   : > { %v1097_v25 = vadd.f32 %v839_v12, %v337_v23  ;;  %v1099_v26 = vadd.f32 %v839_v12, %v332_v24 }
  0xbd   : > { %v370_v31 = vmul.f32 %v1093_v22, %v1093_v22  ;;  %v372_v35 = vmul.f32 %v1091_v20, %v1091_v20 }
  0xbe   : > { %378 = vadd.xlane.f32.xlu1 %v368_v19  ;;  %362 = vadd.xlane.f32.xlu0 %v1091_v20  ;;  %v369_v27 = vmul.f32 %v1097_v25, %v1097_v25  ;;  %v367_v34 = vmul.f32 %v1099_v26, %v1099_v26  ;;  %v1146_v19 = vld [vmem:[%s1283_s2 + $0x2] ss:$0 sm:$0xff] }
  0xc0   : > { %358 = vadd.xlane.f32.xlu2 %v1093_v22 }
  0xc2   : > { %v347_v28 = vpop.f32.mrf.mxu3  ;;  %v342_v29 = vpop.f32.mrf.mxu2 }
  0xc3   : > { %v1105_v30 = vadd.f32 %v839_v12, %v347_v28  ;;  %v1109_v32 = vadd.f32 %v839_v12, %v342_v29  ;;  %v1140_v12 = vld [vmem:[%s1283_s2 + $0x1] ss:$0 sm:$0xff] }
  0xc5   : > { %v371_v33 = vmul.f32 %v1109_v32, %v1109_v32  ;;  %v373_v36 = vmul.f32 %v1105_v30, %v1105_v30 }
  0xc6   : > { %356 = vadd.xlane.f32.xlu1 %v1097_v25  ;;  %352 = vadd.xlane.f32.xlu0 %v1099_v26 }
  0xc8   : > { %380 = vadd.xlane.f32.xlu2 %v369_v27 }
  0xce   : > { %364 = vadd.xlane.f32.xlu1 %v1105_v30  ;;  %382 = vadd.xlane.f32.xlu0 %v370_v31 }
  0xd0   : > { %360 = vadd.xlane.f32.xlu2 %v1109_v32 }
  0xd6   : > { %384 = vadd.xlane.f32.xlu1 %v371_v33  ;;  %376 = vadd.xlane.f32.xlu0 %v367_v34 }
  0xd8   : > { %386 = vadd.xlane.f32.xlu2 %v372_v35 }
  0xde   : > { %388 = vadd.xlane.f32.xlu0 %v373_v36 }
 0x129   : > { %v355_v37 = vpop.xlane.xlu1 %354  ;;  %v351_v38 = vpop.xlane.xlu0 %350 }
 0x12a   : > { %v390_v39 = vmul.f32 0.0078125, %v351_v38  ;;  %v1121_v43 = vmul.f32 0.0078125, %v355_v37 }
 0x12b   : > { %v375_v40 = vpop.xlane.xlu2 %374 }
 0x12c   : > { %v406_v41 = vmul.f32 %v390_v39, %v390_v39  ;;  %v398_v42 = vmul.f32 0.0078125, %v375_v40  ;;  %v408_v45 = vmul.f32 %v1121_v43, %v1121_v43  ;;  %v510_v11 = vsub.f32 %v1081_v15, %v390_v39 }
 0x12d   : > { %v512_v33 = vsub.f32 %v1083_v16, %v1121_v43 }
 0x12e   : > { %v414_v44 = vsub.f32 %v398_v42, %v406_v41 }
 0x130   : > { %v422_v46 = vadd.f32 1e-05, %v414_v44 }
 0x131   : > { %v379_v47 = vpop.xlane.xlu1 %378  ;;  %v363_v48 = vpop.xlane.xlu0 %362 }
 0x132   : > { %v400_v49 = vmul.f32 0.0078125, %v379_v47  ;;  %842 = vrsqrt.f32 %v422_v46  ;;  %vm436_vm1 = vweird.f32 %v422_v46  ;;  %v1150_v23 = vmul.f32 0.0078125, %v363_v48 }
 0x133   : > { %v359_v50 = vpop.xlane.xlu2 %358 }
 0x134   : > { %v416_v51 = vsub.f32 %v400_v49, %v408_v45  ;;  %v1129_v3 = vmul.f32 0.0078125, %v359_v50  ;;  %v412_v16 = vmul.f32 %v1150_v23, %v1150_v23 }
 0x136   : > { %v424_v52 = vadd.f32 1e-05, %v416_v51  ;;  %v410_v9 = vmul.f32 %v1129_v3, %v1129_v3 }
 0x138   : > { %844 = vrsqrt.f32 %v424_v52  ;;  %v843_v53 = vpop.eup %842  ;;  %vm456_vm4 = vweird.f32 %v424_v52 }
 0x139   : > { %v357_v54 = vpop.xlane.xlu1 %356  ;;  %v353_v55 = vpop.xlane.xlu0 %352  ;;  %v431_v56 = vmul.f32 %v843_v53, %v422_v46  ;;  %vm437_vm0 = vweird.f32 %v843_v53 }
 0x13a   : > { %v1125_v57 = vmul.f32 0.0078125, %v357_v54  ;;  %vm438_vm2 = vmor %vm436_vm1, %vm437_vm0  ;;  %v1157_v31 = vmul.f32 0.0078125, %v353_v55 }
 0x13b   : > { %v381_v58 = vpop.xlane.xlu2 %380  ;;  %v432_v59 = vmul.f32 %v843_v53, %v431_v56 }
 0x13c   : > { %v409_v60 = vmul.f32 %v1125_v57, %v1125_v57  ;;  %v401_v61 = vmul.f32 0.0078125, %v381_v58  ;;  %v407_v43 = vmul.f32 %v1157_v31, %v1157_v31 }
 0x13d   : > { %v433_v63 = vmul.f32 0.5, %v432_v59 }
 0x13e   : > { %v845_v62 = vpop.eup %844  ;;  %v417_v1 = vsub.f32 %v401_v61, %v409_v60 }
 0x13f   : > { %v451_v0 = vmul.f32 %v845_v62, %v424_v52  ;;  %v434_v2 = vsub.f32 1.5, %v433_v63  ;;  %vm457_vm3 = vweird.f32 %v845_v62 }
 0x140   : > { %v1131_v5 = vadd.f32 1e-05, %v417_v1  ;;  %vm458_vm5 = vmor %vm456_vm4, %vm457_vm3 }
 0x141   : > { %v452_v4 = vmul.f32 %v845_v62, %v451_v0  ;;  %v365_v6 = vpop.xlane.xlu1 %364  ;;  %v383_v7 = vpop.xlane.xlu0 %382  ;;  %v435_v8 = vmul.f32 %v843_v53, %v434_v2 }
 0x142   : > { %v402_v10 = vmul.f32 0.0078125, %v383_v7  ;;  %846 = vrsqrt.f32 %v1131_v5  ;;  %v1174_v50 = vmul.f32 0.0078125, %v365_v6  ;;  %vm466_vm7 = vweird.f32 %v1131_v5 }
 0x143   : > { %v453_v13 = vmul.f32 0.5, %v452_v4  ;;  %v361_v14 = vpop.xlane.xlu2 %360  ;;  %v439_v17 = vsel %vm438_vm2, %v843_v53, %v435_v8  ;;  %v513_v4 = vsub.f32 %v1097_v25, %v1125_v57  ;;  %v514_v57 = vsub.f32 %v1093_v22, %v1129_v3 }
 0x144   : > { %v418_v18 = vsub.f32 %v402_v10, %v410_v9  ;;  %v518_v15 = vmul.f32 %v510_v11, %v439_v17  ;;  %v1154_v27 = vmul.f32 0.0078125, %v361_v14  ;;  %v413_v1 = vmul.f32 %v1174_v50, %v1174_v50 }
 0x145   : > { %v454_v21 = vsub.f32 1.5, %v453_v13 }
 0x146   : > { %v1152_v24 = vadd.f32 1e-05, %v418_v18  ;;  %v528_v28 = vmul.f32 %v1140_v12, %v518_v15  ;;  %v411_v41 = vmul.f32 %v1154_v27, %v1154_v27 }
 0x147   : > { %v455_v29 = vmul.f32 %v845_v62, %v454_v21 }
 0x148   : > { %848 = vrsqrt.f32 %v1152_v24  ;;  %v847_v34 = vpop.eup %846  ;;  %v538_v35 = vadd.f32 %v1146_v19, %v528_v28  ;;  %vm476_vm10 = vweird.f32 %v1152_v24 }
 0x149   : > { %v459_v36 = vsel %vm458_vm5, %v845_v62, %v455_v29  ;;  %v385_v37 = vpop.xlane.xlu1 %384  ;;  %v377_v38 = vpop.xlane.xlu0 %376  ;;  %v461_v40 = vmul.f32 %v847_v34, %v1131_v5  ;;  %vm467_vm6 = vweird.f32 %v847_v34 }
 0x14a   : > { %v520_v39 = vmul.f32 %v512_v33, %v459_v36  ;;  %v403_v42 = vmul.f32 0.0078125, %v385_v37  ;;  %546 = vst [vmem:[%s1166_s9] sm:$0xff] %v538_v35  ;;  %v399_v44 = vmul.f32 0.0078125, %v377_v38  ;;  %vm468_vm8 = vmor %vm466_vm7, %vm467_vm6 }
 0x14b   : > { %v387_v45 = vpop.xlane.xlu2 %386  ;;  %v462_v47 = vmul.f32 %v847_v34, %v461_v40 }
 0x14c   : > { %v530_v46 = vmul.f32 %v1140_v12, %v520_v39  ;;  %v419_v48 = vsub.f32 %v403_v42, %v411_v41  ;;  %v404_v49 = vmul.f32 0.0078125, %v387_v45  ;;  %v415_v51 = vsub.f32 %v399_v44, %v407_v43 }
 0x14d   : > { %v463_v54 = vmul.f32 0.5, %v462_v47  ;;  %v511_v44 = vsub.f32 %v1099_v26, %v1157_v31  ;;  %v515_v45 = vsub.f32 %v1109_v32, %v1154_v27 }
 0x14e   : > { %v849_v52 = vpop.eup %848  ;;  %v540_v53 = vadd.f32 %v1146_v19, %v530_v46  ;;  %v1177_v55 = vadd.f32 1e-05, %v419_v48  ;;  %v420_v56 = vsub.f32 %v404_v49, %v412_v16  ;;  %v1180_v59 = vadd.f32 1e-05, %v415_v51 }
 0x14f   : > { %v471_v58 = vmul.f32 %v849_v52, %v1152_v24  ;;  %v464_v60 = vsub.f32 1.5, %v463_v54  ;;  %vm477_vm9 = vweird.f32 %v849_v52  ;;  %v516_v51 = vsub.f32 %v1091_v20, %v1150_v23 }
 0x150   : > { %548 = vst [vmem:[%s1166_s9 + $0x10] sm:$0xff] %v540_v53  ;;  %850 = vrsqrt.f32 %v1177_v55  ;;  %v1184_v61 = vadd.f32 1e-05, %v420_v56  ;;  %vm478_vm11 = vmor %vm476_vm10, %vm477_vm9  ;;  %vm486_vm13 = vweird.f32 %v1177_v55  ;;  %vm446_vm1 = vweird.f32 %v1180_v59 }
 0x151   : > { %v472_v62 = vmul.f32 %v849_v52, %v471_v58  ;;  %852 = vrsqrt.f32 %v1180_v59  ;;  %v389_v63 = vpop.xlane.xlu0 %388  ;;  %v465_v0 = vmul.f32 %v847_v34, %v464_v60  ;;  %v517_v60 = vsub.f32 %v1105_v30, %v1174_v50 }
 0x152   : > { %854 = vrsqrt.f32 %v1184_v61  ;;  %v405_v2 = vmul.f32 0.0078125, %v389_v63  ;;  %vm496_vm3 = vweird.f32 %v1184_v61 }
 0x153   : > { %v473_v6 = vmul.f32 0.5, %v472_v62  ;;  %v469_v7 = vsel %vm468_vm8, %v847_v34, %v465_v0 }
 0x154   : > { %v421_v8 = vsub.f32 %v405_v2, %v413_v1  ;;  %v521_v9 = vmul.f32 %v513_v4, %v469_v7 }
 0x155   : > { %v474_v5 = vsub.f32 1.5, %v473_v6 }
 0x156   : > { %v851_v10 = vpop.eup %850  ;;  %v1193_v11 = vadd.f32 1e-05, %v421_v8  ;;  %v531_v14 = vmul.f32 %v1140_v12, %v521_v9 }
 0x157   : > { %v853_v13 = vpop.eup %852  ;;  %v475_v17 = vmul.f32 %v849_v52, %v474_v5  ;;  %v481_v18 = vmul.f32 %v851_v10, %v1177_v55  ;;  %vm487_vm12 = vweird.f32 %v851_v10 }
 0x158   : > { %v855_v25 = vpop.eup %854  ;;  %v441_v15 = vmul.f32 %v853_v13, %v1180_v59  ;;  %856 = vrsqrt.f32 %v1193_v11  ;;  %v541_v21 = vadd.f32 %v1146_v19, %v531_v14  ;;  %vm447_vm14 = vweird.f32 %v853_v13  ;;  %vm488_vm0 = vmor %vm486_vm13, %vm487_vm12 }
 0x159   : > { %v479_v28 = vsel %vm478_vm11, %v849_v52, %v475_v17  ;;  %v482_v29 = vmul.f32 %v851_v10, %v481_v18  ;;  %v491_v33 = vmul.f32 %v855_v25, %v1184_v61  ;;  %vm497_vm15 = vweird.f32 %v855_v25  ;;  %vm448_vm2 = vmor %vm446_vm1, %vm447_vm14 }
 0x15a   : > { %v522_v34 = vmul.f32 %v514_v57, %v479_v28  ;;  %v442_v24 = vmul.f32 %v853_v13, %v441_v15  ;;  %549 = vst [vmem:[%s1166_s9 + $0x18] sm:$0xff] %v541_v21  ;;  %vm498_vm4 = vmor %vm496_vm3, %vm497_vm15  ;;  %vm506_vm6 = vweird.f32 %v1193_v11 }
 0x15b   : > { %v483_v35 = vmul.f32 0.5, %v482_v29  ;;  %v492_v36 = vmul.f32 %v855_v25, %v491_v33 }
 0x15c   : > { %v532_v22 = vmul.f32 %v1140_v12, %v522_v34  ;;  %v443_v3 = vmul.f32 0.5, %v442_v24 }
 0x15d   : > { %v484_v37 = vsub.f32 1.5, %v483_v35  ;;  %v493_v38 = vmul.f32 0.5, %v492_v36 }
 0x15e   : > { %v857_v39 = vpop.eup %856  ;;  %v542_v40 = vadd.f32 %v1146_v19, %v532_v22  ;;  %v444_v41 = vsub.f32 1.5, %v443_v3 }
 0x15f   : > { %v485_v42 = vmul.f32 %v851_v10, %v484_v37  ;;  %v494_v16 = vsub.f32 1.5, %v493_v38  ;;  %v501_v43 = vmul.f32 %v857_v39, %v1193_v11  ;;  %vm507_vm5 = vweird.f32 %v857_v39 }
 0x160   : > { %550 = vst [vmem:[%s1166_s9 + $0x20] sm:$0xff] %v542_v40  ;;  %v445_v46 = vmul.f32 %v853_v13, %v444_v41  ;;  %vm508_vm7 = vmor %vm506_vm6, %vm507_vm5 }
 0x161   : > { %v489_v47 = vsel %vm488_vm0, %v851_v10, %v485_v42  ;;  %v495_v48 = vmul.f32 %v855_v25, %v494_v16  ;;  %v502_v49 = vmul.f32 %v857_v39, %v501_v43 }
 0x162   : > { %v523_v26 = vmul.f32 %v515_v45, %v489_v47  ;;  %v449_v31 = vsel %vm448_vm2, %v853_v13, %v445_v46 }
 0x163   : > { %v519_v32 = vmul.f32 %v511_v44, %v449_v31  ;;  %v499_v27 = vsel %vm498_vm4, %v855_v25, %v495_v48  ;;  %v503_v52 = vmul.f32 0.5, %v502_v49 }
 0x164   : > { %v533_v53 = vmul.f32 %v1140_v12, %v523_v26  ;;  %v524_v54 = vmul.f32 %v516_v51, %v499_v27 }
 0x165   : > { %v529_v55 = vmul.f32 %v1140_v12, %v519_v32  ;;  %v504_v56 = vsub.f32 1.5, %v503_v52 }
 0x166   : > { %v543_v20 = vadd.f32 %v1146_v19, %v533_v53  ;;  %v534_v23 = vmul.f32 %v1140_v12, %v524_v54 }
 0x167   : > { %v539_v58 = vadd.f32 %v1146_v19, %v529_v55  ;;  %v505_v59 = vmul.f32 %v857_v39, %v504_v56 }
 0x168   : > { %551 = vst [vmem:[%s1166_s9 + $0x28] sm:$0xff] %v543_v20  ;;  %v544_v61 = vadd.f32 %v1146_v19, %v534_v23 }
 0x169   : > { %547 = vst [vmem:[%s1166_s9 + $0x8] sm:$0xff] %v539_v58  ;;  %v509_v62 = vsel %vm508_vm7, %v857_v39, %v505_v59 }
 0x16a   : > { %552 = vst [vmem:[%s1166_s9 + $0x30] sm:$0xff] %v544_v61  ;;  %v525_v63 = vmul.f32 %v517_v60, %v509_v62 }
 0x16c   : > { %v535_v0 = vmul.f32 %v1140_v12, %v525_v63 }
 0x16e   : > { %v545_v1 = vadd.f32 %v1146_v19, %v535_v0 }
 0x170   : > { %553 = vst [vmem:[%s1166_s9 + $0x38] sm:$0xff] %v545_v1 }
 0x171   : > { %885 = shalt.err (!%p882_p7)
}
 0x172   : > { %s954_s29 = smov 128   ;;  %s955_s9 = smov 8  }
 0x173   : > { %766 = dma.vmem_to_hbm [thread:$0]  (%p1027_p3), %s572_s27, 1024, %s574_s28, %s555_s4, %s954_s29, %s954_s29, %s955_s9  }
 0x174 PF: > { %p772_p9 = scmp.ge.s32.totalorder %s952_s19, 2  ;;  %s588_s16 = sand.u32 1, %s924_s12  }
 0x175   : > { %s589_s20 = scalar_lea.sflag [#allocation3], %s588_s16 }
 0x176   : > { %p769_p10 = pnand %p772_p9, %p1036_p8 }
 0x178   : > { %p770_p11 = pneg %p769_p10 }
 0x17a   : > { %919 = dma.done.wait (%p770_p11), %s589_s20, 1024  }
 0x17b   : > { %921 = vsyncadd (%p770_p11), %s589_s20, 4294966272  ;;  %s16_s19 = sadd.s32 1, %s952_s19   ;;  %s1287_s12 = smov %s928_s13 }
 0x17c   : > { %p13_p12 = scmp.ge.s32.totalorder %s16_s19, 6   ;;  %s1288_s13 = smov %s932_s14 }
 0x17d   : > { %s1289_s14 = smov %s1045_s30  ;;  %s1290_s15 = smov %s944_s17 }
 0x17e   : > { %s1291_s16 = smov %s948_s18  ;;  %s1292_s17 = smov %s1295_s22 }
 0x17f   : > { %s1293_s18 = smov %s1299_s23  ;;  %15 = sbr.rel (!%p13_p12) target bundleno = 5 (0x5), region = 67 }
 0x184   :  { %595 = vsyncpa [#allocation3], 1 }
 0x185   :  { %597 = vsyncpa [#allocation3 + $0x1], 1 }

</bundles_post_ra>
